<compile_context>
chip_gen: v6e
topology: v6e:2x2x1
jax: 0.10.0
libtpu: 0.0.40
codegen_flags: <defaults>
</compile_context>

<pallas_src>
import functools
import math

import jax
import jax.numpy as jnp
from jax.experimental import pallas as pl
from jax.experimental.pallas import tpu as pltpu


LEAKY_SLOPE = 0.2
BN_EPS = 1e-5


def _leaky_relu(x):
    return jnp.where(x >= 0, x, LEAKY_SLOPE * x)


def _bn_leaky(h, gamma, beta, inv_b):
    """Train-mode BatchNorm1d (biased batch variance) + LeakyReLU, one pass."""
    s1 = jnp.sum(h, axis=0, keepdims=True)
    s2 = jnp.sum(h * h, axis=0, keepdims=True)
    mean = s1 * inv_b
    var = s2 * inv_b - mean * mean            # E[h^2] - E[h]^2 (biased)
    scale = gamma * jax.lax.rsqrt(var + BN_EPS)
    shift = beta - mean * scale
    h = h * scale + shift
    return _leaky_relu(h)


def _generator_kernel(
    z_ref, s_ref,                       # (B, Lz) f32, (B, Ls) f32
    w1z_ref, w1s_ref, b1_ref,           # fcin : (Lz,U0) bf16, (Ls,U0) bf16, (1,U0) f32
    w2_ref, b2_ref, g2_ref, be2_ref,    # fc1/bn1 : (U0,U1) bf16, (1,U1) f32 x3
    w3_ref, b3_ref, g3_ref, be3_ref,    # fc2/bn2 : (U1,U2) bf16, (1,U2) f32 x3
    wo_ref, bo_ref,                     # fcout tile : (U2,TN) bf16, (1,TN) f32
    o_ref,                              # (B, TN) f32
    h_ref,                              # scratch (B, U2) f32, resident across grid
):
    inv_b = 1.0 / z_ref.shape[0]

    # Hidden layers are identical for every output-feature tile: compute once.
    @pl.when(pl.program_id(0) == 0)
    def _compute_hidden():
        # fcin (split dot replaces the concat) + LeakyReLU
        h = (
            jnp.dot(z_ref[...].astype(jnp.bfloat16), w1z_ref[...],
                    preferred_element_type=jnp.float32)
            + jnp.dot(s_ref[...].astype(jnp.bfloat16), w1s_ref[...],
                      preferred_element_type=jnp.float32)
            + b1_ref[...]
        )
        h = _leaky_relu(h)

        # fc1 + BatchNorm1d (batch stats) + LeakyReLU
        h = jnp.dot(h.astype(jnp.bfloat16), w2_ref[...],
                    preferred_element_type=jnp.float32) + b2_ref[...]
        h = _bn_leaky(h, g2_ref[...], be2_ref[...], inv_b)

        # fc2 + BatchNorm1d (batch stats) + LeakyReLU
        h = jnp.dot(h.astype(jnp.bfloat16), w3_ref[...],
                    preferred_element_type=jnp.float32) + b3_ref[...]
        h = _bn_leaky(h, g3_ref[...], be3_ref[...], inv_b)

        h_ref[...] = h

    # fcout tile j: logits[:, j*TN:(j+1)*TN]  (no activation)
    out = jnp.dot(h_ref[...].astype(jnp.bfloat16), wo_ref[...],
                  preferred_element_type=jnp.float32) + bo_ref[...]
    o_ref[...] = out.astype(o_ref.dtype)


def _pick_fcout_tile(fcout_dim, max_tn=1024):
    """Largest lane-dense tile (multiple of 128, <= max_tn) dividing fcout_dim."""
    if fcout_dim <= max_tn:
        return fcout_dim
    for tn in range(max_tn, 127, -128):
        if fcout_dim % tn == 0:
            return tn
    return fcout_dim  # indivisible: fall back to a single (un-tiled) block


@functools.partial(jax.jit, static_argnames=("n_t", "n_cell"))
def generator_forward(z, stim, params, *, n_t, n_cell):
    """Pallas implementation of Generator.forward.

    z:    (B, latent_dim)
    stim: (B, *stim_shape)
    returns logits of shape (B, n_t, n_cell)

    Note: batch must stay a single block (BatchNorm batch statistics).
    """
    B = z.shape[0]
    latent_dim = z.shape[1]
    z = z.astype(jnp.float32)
    stim_flat = stim.reshape(B, -1).astype(jnp.float32)

    # Split fcin weight by input rows (z part / stim part); cast weights to bf16
    # for the MXU, keep biases / BN params in f32.
    w1 = params["w1"]
    w1z = w1[:latent_dim].astype(jnp.bfloat16)
    w1s = w1[latent_dim:].astype(jnp.bfloat16)
    w2 = params["w2"].astype(jnp.bfloat16)
    w3 = params["w3"].astype(jnp.bfloat16)
    wo = params["wo"].astype(jnp.bfloat16)

    U2 = wo.shape[0]
    fcout_dim = n_t * n_cell
    tn = _pick_fcout_tile(fcout_dim)
    grid = (fcout_dim // tn,)

    def full2d(shape):
        # Whole-array block, same block every grid step (stays resident in VMEM).
        return pl.BlockSpec(shape, lambda j: (0, 0))

    in_specs = [
        full2d(z.shape),                 # z
        full2d(stim_flat.shape),         # stim (flattened)
        full2d(w1z.shape), full2d(w1s.shape), full2d(params["b1"].shape),
        full2d(w2.shape), full2d(params["b2"].shape),
        full2d(params["g2"].shape), full2d(params["be2"].shape),
        full2d(w3.shape), full2d(params["b3"].shape),
        full2d(params["g3"].shape), full2d(params["be3"].shape),
        pl.BlockSpec((U2, tn), lambda j: (0, j)),     # wo, streamed over fcout
        pl.BlockSpec((1, tn), lambda j: (0, j)),      # bo, streamed over fcout
    ]
    out_specs = pl.BlockSpec((B, tn), lambda j: (0, j))

    logits = pl.pallas_call(
        _generator_kernel,
        out_shape=jax.ShapeDtypeStruct((B, fcout_dim), jnp.float32),
        grid=grid,
        in_specs=in_specs,
        out_specs=out_specs,
        scratch_shapes=[pltpu.VMEM((B, U2), jnp.float32)],
        compiler_params=pltpu.CompilerParams(
            # The fcout axis reuses the resident hidden state computed at j==0,
            # so it must run sequentially on one core.
            dimension_semantics=("arbitrary",),
            vmem_limit_bytes=48 * 1024 * 1024,
        ),
    )(
        z, stim_flat,
        w1z, w1s, params["b1"],
        w2, params["b2"], params["g2"], params["be2"],
        w3, params["b3"], params["g3"], params["be3"],
        wo, params["bo"],
    )

    return logits.reshape(B, n_t, n_cell)


def init_params(key, latent_dim, in_dim, n_units, fcout_dim):
    """Deterministic PyTorch-style (uniform +-1/sqrt(fan_in)) init.

    Linear weights are stored transposed: (in_features, out_features).
    BatchNorm: gamma=1, beta=0.
    """
    def linear(k, fan_in, fan_out):
        kw, kb = jax.random.split(k)
        bound = 1.0 / math.sqrt(fan_in)
        w = jax.random.uniform(kw, (fan_in, fan_out), jnp.float32, -bound, bound)
        b = jax.random.uniform(kb, (1, fan_out), jnp.float32, -bound, bound)
        return w, b

    k1, k2, k3, k4 = jax.random.split(key, 4)
    d0 = latent_dim + in_dim
    w1, b1 = linear(k1, d0, n_units[0])
    w2, b2 = linear(k2, n_units[0], n_units[1])
    w3, b3 = linear(k3, n_units[1], n_units[2])
    wo, bo = linear(k4, n_units[2], fcout_dim)
    return {
        "w1": w1, "b1": b1,
        "w2": w2, "b2": b2,
        "g2": jnp.ones((1, n_units[1]), jnp.float32),
        "be2": jnp.zeros((1, n_units[1]), jnp.float32),
        "w3": w3, "b3": b3,
        "g3": jnp.ones((1, n_units[2]), jnp.float32),
        "be3": jnp.zeros((1, n_units[2]), jnp.float32),
        "wo": wo, "bo": bo,
    }


def _reference_forward(z, stim, params, n_t, n_cell):
    """Pure-JAX reference with the same numerics (bf16 MXU operands, f32 acc)."""
    B = z.shape[0]
    x = jnp.concatenate([z, stim.reshape(B, -1)], axis=-1).astype(jnp.float32)

    def dot_bf16(a, w):
        return jnp.dot(a.astype(jnp.bfloat16), w.astype(jnp.bfloat16),
                       preferred_element_type=jnp.float32)

    def bn_leaky(h, g, b):
        m = h.mean(0, keepdims=True)
        v = (h * h).mean(0, keepdims=True) - m * m
        scale = g * jax.lax.rsqrt(v + BN_EPS)
        h = h * scale + (b - m * scale)
        return jnp.where(h >= 0, h, LEAKY_SLOPE * h)

    h = dot_bf16(x, params["w1"]) + params["b1"]
    h = jnp.where(h >= 0, h, LEAKY_SLOPE * h)
    h = bn_leaky(dot_bf16(h, params["w2"]) + params["b2"],
                 params["g2"], params["be2"])
    h = bn_leaky(dot_bf16(h, params["w3"]) + params["b3"],
                 params["g3"], params["be3"])
    out = dot_bf16(h, params["wo"]) + params["bo"]
    return out.reshape(B, n_t, n_cell)


if __name__ == "__main__":
    # Small shapes consistent with the module.
    B = 16                          # batch (single block; BN stats over batch)
    latent_dim = 8
    stim_shape = (1, 4, 4)          # in_dim = 16
    sp_shape = (8, 16)              # (n_t, n_cell) -> fcout_dim = 128
    n_units = [128, 256, 128]

    in_dim = math.prod(stim_shape)
    n_t, n_cell = sp_shape
    fcout_dim = n_t * n_cell

    key = jax.random.PRNGKey(0)
    kp, kz, ks = jax.random.split(key, 3)
    params = init_params(kp, latent_dim, in_dim, n_units, fcout_dim)

    z = jax.random.normal(kz, (B, latent_dim), jnp.float32)
    stim = jax.random.normal(ks, (B,) + stim_shape, jnp.float32)

    logits = generator_forward(z, stim, params, n_t=n_t, n_cell=n_cell)
    logits = jax.block_until_ready(logits)

    assert logits.shape == (B, n_t, n_cell)

    ref = _reference_forward(z, stim, params, n_t, n_cell)
    assert jnp.allclose(logits, ref, rtol=2e-3, atol=2e-3), "mismatch vs reference"

    # TODO(synk): Generator.generate() draws Bernoulli samples from the logits;
    # sampling is left outside the kernel (would use pltpu.prng_random_bits).
    print("KERNEL_OK")
</pallas_src>

<mosaic_0001>
module attributes {stable_mosaic.version = 11 : i64} {
  func.func @_generator_kernel(%arg0: i32, %arg1: memref<16x8xf32, #tpu.memory_space<vmem>>, %arg2: memref<16x16xf32, #tpu.memory_space<vmem>>, %arg3: memref<8x128xbf16, #tpu.memory_space<vmem>>, %arg4: memref<16x128xbf16, #tpu.memory_space<vmem>>, %arg5: memref<1x128xf32, #tpu.memory_space<vmem>>, %arg6: memref<128x256xbf16, #tpu.memory_space<vmem>>, %arg7: memref<1x256xf32, #tpu.memory_space<vmem>>, %arg8: memref<1x256xf32, #tpu.memory_space<vmem>>, %arg9: memref<1x256xf32, #tpu.memory_space<vmem>>, %arg10: memref<256x128xbf16, #tpu.memory_space<vmem>>, %arg11: memref<1x128xf32, #tpu.memory_space<vmem>>, %arg12: memref<1x128xf32, #tpu.memory_space<vmem>>, %arg13: memref<1x128xf32, #tpu.memory_space<vmem>>, %arg14: memref<128x128xbf16, #tpu.memory_space<vmem>>, %arg15: memref<1x128xf32, #tpu.memory_space<vmem>>, %arg16: memref<16x128xf32, #tpu.memory_space<vmem>>, %arg17: memref<16x128xf32, #tpu.memory_space<vmem>>) attributes {dimension_semantics = [#tpu.dimension_semantics<arbitrary>], iteration_bounds = array<i64: 1>, scalar_prefetch = 0 : i64, scratch_operands = 1 : i64, tpu.core_type = #tpu.core_type<tc>, window_params = [{pipeline_mode = #tpu.pipeline_mode<synchronous>, transform_indices = @transform_0, window_bounds = array<i64: 16, 8>}, {pipeline_mode = #tpu.pipeline_mode<synchronous>, transform_indices = @transform_1, window_bounds = array<i64: 16, 16>}, {pipeline_mode = #tpu.pipeline_mode<synchronous>, transform_indices = @transform_2, window_bounds = array<i64: 8, 128>}, {pipeline_mode = #tpu.pipeline_mode<synchronous>, transform_indices = @transform_3, window_bounds = array<i64: 16, 128>}, {pipeline_mode = #tpu.pipeline_mode<synchronous>, transform_indices = @transform_4, window_bounds = array<i64: 1, 128>}, {pipeline_mode = #tpu.pipeline_mode<synchronous>, transform_indices = @transform_5, window_bounds = array<i64: 128, 256>}, {pipeline_mode = #tpu.pipeline_mode<synchronous>, transform_indices = @transform_6, window_bounds = array<i64: 1, 256>}, {pipeline_mode = #tpu.pipeline_mode<synchronous>, transform_indices = @transform_7, window_bounds = array<i64: 1, 256>}, {pipeline_mode = #tpu.pipeline_mode<synchronous>, transform_indices = @transform_8, window_bounds = array<i64: 1, 256>}, {pipeline_mode = #tpu.pipeline_mode<synchronous>, transform_indices = @transform_9, window_bounds = array<i64: 256, 128>}, {pipeline_mode = #tpu.pipeline_mode<synchronous>, transform_indices = @transform_10, window_bounds = array<i64: 1, 128>}, {pipeline_mode = #tpu.pipeline_mode<synchronous>, transform_indices = @transform_11, window_bounds = array<i64: 1, 128>}, {pipeline_mode = #tpu.pipeline_mode<synchronous>, transform_indices = @transform_12, window_bounds = array<i64: 1, 128>}, {transform_indices = @transform_13, window_bounds = array<i64: 128, 128>}, {transform_indices = @transform_14, window_bounds = array<i64: 1, 128>}, {transform_indices = @transform_15, window_bounds = array<i64: 16, 128>}]} {
    %c0_i32 = arith.constant 0 : i32
    %0 = arith.cmpi eq, %arg0, %c0_i32 : i32
    %1 = arith.extui %0 : i1 to i32
    %c0_i32_0 = arith.constant 0 : i32
    %2 = arith.cmpi ne, %1, %c0_i32_0 : i32
    scf.if %2 {
      %c0_8 = arith.constant 0 : index
      %c0_9 = arith.constant 0 : index
      %11 = vector.load %arg1[%c0_8, %c0_9] : memref<16x8xf32, #tpu.memory_space<vmem>>, vector<16x8xf32>
      %12 = arith.truncf %11 : vector<16x8xf32> to vector<16x8xbf16>
      %c0_10 = arith.constant 0 : index
      %c0_11 = arith.constant 0 : index
      %13 = vector.load %arg3[%c0_10, %c0_11] : memref<8x128xbf16, #tpu.memory_space<vmem>>, vector<8x128xbf16>
      %cst_12 = arith.constant dense<0.000000e+00> : vector<16x128xf32>
      %14 = tpu.matmul %12, %13, %cst_12 {dimension_numbers = #tpu.dot_dimension_numbers<[1], [0], [0], [1], [0, 0, 1, 1], [], []>} : vector<16x8xbf16>, vector<8x128xbf16>, vector<16x128xf32> -> vector<16x128xf32>
      %c0_13 = arith.constant 0 : index
      %c0_14 = arith.constant 0 : index
      %15 = vector.load %arg2[%c0_13, %c0_14] : memref<16x16xf32, #tpu.memory_space<vmem>>, vector<16x16xf32>
      %16 = arith.truncf %15 : vector<16x16xf32> to vector<16x16xbf16>
      %c0_15 = arith.constant 0 : index
      %c0_16 = arith.constant 0 : index
      %17 = vector.load %arg4[%c0_15, %c0_16] : memref<16x128xbf16, #tpu.memory_space<vmem>>, vector<16x128xbf16>
      %cst_17 = arith.constant dense<0.000000e+00> : vector<16x128xf32>
      %18 = tpu.matmul %16, %17, %cst_17 {dimension_numbers = #tpu.dot_dimension_numbers<[1], [0], [0], [1], [0, 0, 1, 1], [], []>} : vector<16x16xbf16>, vector<16x128xbf16>, vector<16x128xf32> -> vector<16x128xf32>
      %19 = arith.addf %14, %18 : vector<16x128xf32>
      %c0_18 = arith.constant 0 : index
      %c0_19 = arith.constant 0 : index
      %20 = vector.load %arg5[%c0_18, %c0_19] : memref<1x128xf32, #tpu.memory_space<vmem>>, vector<1x128xf32>
      %21 = vector.broadcast %20 : vector<1x128xf32> to vector<16x128xf32>
      %22 = arith.addf %19, %21 : vector<16x128xf32>
      %cst_20 = arith.constant 0.000000e+00 : f32
      %23 = vector.broadcast %cst_20 : f32 to vector<16x128xf32>
      %24 = arith.cmpf oge, %22, %23 : vector<16x128xf32>
      %cst_21 = arith.constant 2.000000e-01 : f32
      %25 = vector.broadcast %cst_21 : f32 to vector<16x128xf32>
      %26 = arith.mulf %25, %22 : vector<16x128xf32>
      %27 = arith.select %24, %22, %26 : vector<16x128xi1>, vector<16x128xf32>
      %28 = arith.truncf %27 : vector<16x128xf32> to vector<16x128xbf16>
      %c0_22 = arith.constant 0 : index
      %c0_23 = arith.constant 0 : index
      %29 = vector.load %arg6[%c0_22, %c0_23] : memref<128x256xbf16, #tpu.memory_space<vmem>>, vector<128x256xbf16>
      %cst_24 = arith.constant dense<0.000000e+00> : vector<16x256xf32>
      %30 = tpu.matmul %28, %29, %cst_24 {dimension_numbers = #tpu.dot_dimension_numbers<[1], [0], [0], [1], [0, 0, 1, 1], [], []>} : vector<16x128xbf16>, vector<128x256xbf16>, vector<16x256xf32> -> vector<16x256xf32>
      %c0_25 = arith.constant 0 : index
      %c0_26 = arith.constant 0 : index
      %31 = vector.load %arg7[%c0_25, %c0_26] : memref<1x256xf32, #tpu.memory_space<vmem>>, vector<1x256xf32>
      %32 = vector.broadcast %31 : vector<1x256xf32> to vector<16x256xf32>
      %33 = arith.addf %30, %32 : vector<16x256xf32>
      %c0_27 = arith.constant 0 : index
      %c0_28 = arith.constant 0 : index
      %34 = vector.load %arg8[%c0_27, %c0_28] : memref<1x256xf32, #tpu.memory_space<vmem>>, vector<1x256xf32>
      %c0_29 = arith.constant 0 : index
      %c0_30 = arith.constant 0 : index
      %35 = vector.load %arg9[%c0_29, %c0_30] : memref<1x256xf32, #tpu.memory_space<vmem>>, vector<1x256xf32>
      %cst_31 = arith.constant dense<0.000000e+00> : vector<256xf32>
      %36 = vector.multi_reduction <add>, %33, %cst_31 [0] : vector<16x256xf32> to vector<256xf32>
      %37 = vector.shape_cast %36 : vector<256xf32> to vector<1x256xf32>
      %38 = arith.mulf %33, %33 : vector<16x256xf32>
      %cst_32 = arith.constant dense<0.000000e+00> : vector<256xf32>
      %39 = vector.multi_reduction <add>, %38, %cst_32 [0] : vector<16x256xf32> to vector<256xf32>
      %40 = vector.shape_cast %39 : vector<256xf32> to vector<1x256xf32>
      %cst_33 = arith.constant 6.250000e-02 : f32
      %41 = vector.broadcast %cst_33 : f32 to vector<1x256xf32>
      %42 = arith.mulf %37, %41 : vector<1x256xf32>
      %cst_34 = arith.constant 6.250000e-02 : f32
      %43 = vector.broadcast %cst_34 : f32 to vector<1x256xf32>
      %44 = arith.mulf %40, %43 : vector<1x256xf32>
      %45 = arith.mulf %42, %42 : vector<1x256xf32>
      %46 = arith.subf %44, %45 : vector<1x256xf32>
      %cst_35 = arith.constant 9.99999974E-6 : f32
      %47 = vector.broadcast %cst_35 : f32 to vector<1x256xf32>
      %48 = arith.addf %46, %47 : vector<1x256xf32>
      %49 = math.rsqrt %48 : vector<1x256xf32>
      %50 = arith.mulf %34, %49 : vector<1x256xf32>
      %51 = arith.mulf %42, %50 : vector<1x256xf32>
      %52 = arith.subf %35, %51 : vector<1x256xf32>
      %53 = vector.broadcast %50 : vector<1x256xf32> to vector<16x256xf32>
      %54 = arith.mulf %33, %53 : vector<16x256xf32>
      %55 = vector.broadcast %52 : vector<1x256xf32> to vector<16x256xf32>
      %56 = arith.addf %54, %55 : vector<16x256xf32>
      %cst_36 = arith.constant 0.000000e+00 : f32
      %57 = vector.broadcast %cst_36 : f32 to vector<16x256xf32>
      %58 = arith.cmpf oge, %56, %57 : vector<16x256xf32>
      %cst_37 = arith.constant 2.000000e-01 : f32
      %59 = vector.broadcast %cst_37 : f32 to vector<16x256xf32>
      %60 = arith.mulf %59, %56 : vector<16x256xf32>
      %61 = arith.select %58, %56, %60 : vector<16x256xi1>, vector<16x256xf32>
      %62 = arith.truncf %61 : vector<16x256xf32> to vector<16x256xbf16>
      %c0_38 = arith.constant 0 : index
      %c0_39 = arith.constant 0 : index
      %63 = vector.load %arg10[%c0_38, %c0_39] : memref<256x128xbf16, #tpu.memory_space<vmem>>, vector<256x128xbf16>
      %cst_40 = arith.constant dense<0.000000e+00> : vector<16x128xf32>
      %64 = tpu.matmul %62, %63, %cst_40 {dimension_numbers = #tpu.dot_dimension_numbers<[1], [0], [0], [1], [0, 0, 1, 1], [], []>} : vector<16x256xbf16>, vector<256x128xbf16>, vector<16x128xf32> -> vector<16x128xf32>
      %c0_41 = arith.constant 0 : index
      %c0_42 = arith.constant 0 : index
      %65 = vector.load %arg11[%c0_41, %c0_42] : memref<1x128xf32, #tpu.memory_space<vmem>>, vector<1x128xf32>
      %66 = vector.broadcast %65 : vector<1x128xf32> to vector<16x128xf32>
      %67 = arith.addf %64, %66 : vector<16x128xf32>
      %c0_43 = arith.constant 0 : index
      %c0_44 = arith.constant 0 : index
      %68 = vector.load %arg12[%c0_43, %c0_44] : memref<1x128xf32, #tpu.memory_space<vmem>>, vector<1x128xf32>
      %c0_45 = arith.constant 0 : index
      %c0_46 = arith.constant 0 : index
      %69 = vector.load %arg13[%c0_45, %c0_46] : memref<1x128xf32, #tpu.memory_space<vmem>>, vector<1x128xf32>
      %cst_47 = arith.constant dense<0.000000e+00> : vector<128xf32>
      %70 = vector.multi_reduction <add>, %67, %cst_47 [0] : vector<16x128xf32> to vector<128xf32>
      %71 = vector.shape_cast %70 : vector<128xf32> to vector<1x128xf32>
      %72 = arith.mulf %67, %67 : vector<16x128xf32>
      %cst_48 = arith.constant dense<0.000000e+00> : vector<128xf32>
      %73 = vector.multi_reduction <add>, %72, %cst_48 [0] : vector<16x128xf32> to vector<128xf32>
      %74 = vector.shape_cast %73 : vector<128xf32> to vector<1x128xf32>
      %cst_49 = arith.constant 6.250000e-02 : f32
      %75 = vector.broadcast %cst_49 : f32 to vector<1x128xf32>
      %76 = arith.mulf %71, %75 : vector<1x128xf32>
      %cst_50 = arith.constant 6.250000e-02 : f32
      %77 = vector.broadcast %cst_50 : f32 to vector<1x128xf32>
      %78 = arith.mulf %74, %77 : vector<1x128xf32>
      %79 = arith.mulf %76, %76 : vector<1x128xf32>
      %80 = arith.subf %78, %79 : vector<1x128xf32>
      %cst_51 = arith.constant 9.99999974E-6 : f32
      %81 = vector.broadcast %cst_51 : f32 to vector<1x128xf32>
      %82 = arith.addf %80, %81 : vector<1x128xf32>
      %83 = math.rsqrt %82 : vector<1x128xf32>
      %84 = arith.mulf %68, %83 : vector<1x128xf32>
      %85 = arith.mulf %76, %84 : vector<1x128xf32>
      %86 = arith.subf %69, %85 : vector<1x128xf32>
      %87 = vector.broadcast %84 : vector<1x128xf32> to vector<16x128xf32>
      %88 = arith.mulf %67, %87 : vector<16x128xf32>
      %89 = vector.broadcast %86 : vector<1x128xf32> to vector<16x128xf32>
      %90 = arith.addf %88, %89 : vector<16x128xf32>
      %cst_52 = arith.constant 0.000000e+00 : f32
      %91 = vector.broadcast %cst_52 : f32 to vector<16x128xf32>
      %92 = arith.cmpf oge, %90, %91 : vector<16x128xf32>
      %cst_53 = arith.constant 2.000000e-01 : f32
      %93 = vector.broadcast %cst_53 : f32 to vector<16x128xf32>
      %94 = arith.mulf %93, %90 : vector<16x128xf32>
      %95 = arith.select %92, %90, %94 : vector<16x128xi1>, vector<16x128xf32>
      %c0_54 = arith.constant 0 : index
      %c0_55 = arith.constant 0 : index
      %96 = vector.load %arg17[%c0_54, %c0_55] : memref<16x128xf32, #tpu.memory_space<vmem>>, vector<16x128xf32>
      tpu.vector_store %arg17[%c0_54, %c0_55], %95 {strides = array<i32>} : memref<16x128xf32, #tpu.memory_space<vmem>>, vector<16x128xf32>,
    } else {
    }
    %c0 = arith.constant 0 : index
    %c0_1 = arith.constant 0 : index
    %3 = vector.load %arg17[%c0, %c0_1] : memref<16x128xf32, #tpu.memory_space<vmem>>, vector<16x128xf32>
    %4 = arith.truncf %3 : vector<16x128xf32> to vector<16x128xbf16>
    %c0_2 = arith.constant 0 : index
    %c0_3 = arith.constant 0 : index
    %5 = vector.load %arg14[%c0_2, %c0_3] : memref<128x128xbf16, #tpu.memory_space<vmem>>, vector<128x128xbf16>
    %cst = arith.constant dense<0.000000e+00> : vector<16x128xf32>
    %6 = tpu.matmul %4, %5, %cst {dimension_numbers = #tpu.dot_dimension_numbers<[1], [0], [0], [1], [0, 0, 1, 1], [], []>} : vector<16x128xbf16>, vector<128x128xbf16>, vector<16x128xf32> -> vector<16x128xf32>
    %c0_4 = arith.constant 0 : index
    %c0_5 = arith.constant 0 : index
    %7 = vector.load %arg15[%c0_4, %c0_5] : memref<1x128xf32, #tpu.memory_space<vmem>>, vector<1x128xf32>
    %8 = vector.broadcast %7 : vector<1x128xf32> to vector<16x128xf32>
    %9 = arith.addf %6, %8 : vector<16x128xf32>
    %c0_6 = arith.constant 0 : index
    %c0_7 = arith.constant 0 : index
    %10 = vector.load %arg16[%c0_6, %c0_7] : memref<16x128xf32, #tpu.memory_space<vmem>>, vector<16x128xf32>
    tpu.vector_store %arg16[%c0_6, %c0_7], %9 {strides = array<i32>} : memref<16x128xf32, #tpu.memory_space<vmem>>, vector<16x128xf32>,
    return
  }
  func.func @transform_0(%arg0: i32) -> (i32, i32) {
    %c0_i32 = arith.constant 0 : i32
    %c0_i32_0 = arith.constant 0 : i32
    %c0_i32_1 = arith.constant 0 : i32
    return %c0_i32, %c0_i32_0 : i32, i32
  }
  func.func @transform_1(%arg0: i32) -> (i32, i32) {
    %c0_i32 = arith.constant 0 : i32
    %c0_i32_0 = arith.constant 0 : i32
    %c0_i32_1 = arith.constant 0 : i32
    return %c0_i32, %c0_i32_0 : i32, i32
  }
  func.func @transform_2(%arg0: i32) -> (i32, i32) {
    %c0_i32 = arith.constant 0 : i32
    %c0_i32_0 = arith.constant 0 : i32
    %c0_i32_1 = arith.constant 0 : i32
    return %c0_i32, %c0_i32_0 : i32, i32
  }
  func.func @transform_3(%arg0: i32) -> (i32, i32) {
    %c0_i32 = arith.constant 0 : i32
    %c0_i32_0 = arith.constant 0 : i32
    %c0_i32_1 = arith.constant 0 : i32
    return %c0_i32, %c0_i32_0 : i32, i32
  }
  func.func @transform_4(%arg0: i32) -> (i32, i32) {
    %c0_i32 = arith.constant 0 : i32
    %c0_i32_0 = arith.constant 0 : i32
    %c0_i32_1 = arith.constant 0 : i32
    return %c0_i32, %c0_i32_0 : i32, i32
  }
  func.func @transform_5(%arg0: i32) -> (i32, i32) {
    %c0_i32 = arith.constant 0 : i32
    %c0_i32_0 = arith.constant 0 : i32
    %c0_i32_1 = arith.constant 0 : i32
    return %c0_i32, %c0_i32_0 : i32, i32
  }
  func.func @transform_6(%arg0: i32) -> (i32, i32) {
    %c0_i32 = arith.constant 0 : i32
    %c0_i32_0 = arith.constant 0 : i32
    %c0_i32_1 = arith.constant 0 : i32
    return %c0_i32, %c0_i32_0 : i32, i32
  }
  func.func @transform_7(%arg0: i32) -> (i32, i32) {
    %c0_i32 = arith.constant 0 : i32
    %c0_i32_0 = arith.constant 0 : i32
    %c0_i32_1 = arith.constant 0 : i32
    return %c0_i32, %c0_i32_0 : i32, i32
  }
  func.func @transform_8(%arg0: i32) -> (i32, i32) {
    %c0_i32 = arith.constant 0 : i32
    %c0_i32_0 = arith.constant 0 : i32
    %c0_i32_1 = arith.constant 0 : i32
    return %c0_i32, %c0_i32_0 : i32, i32
  }
  func.func @transform_9(%arg0: i32) -> (i32, i32) {
    %c0_i32 = arith.constant 0 : i32
    %c0_i32_0 = arith.constant 0 : i32
    %c0_i32_1 = arith.constant 0 : i32
    return %c0_i32, %c0_i32_0 : i32, i32
  }
  func.func @transform_10(%arg0: i32) -> (i32, i32) {
    %c0_i32 = arith.constant 0 : i32
    %c0_i32_0 = arith.constant 0 : i32
    %c0_i32_1 = arith.constant 0 : i32
    return %c0_i32, %c0_i32_0 : i32, i32
  }
  func.func @transform_11(%arg0: i32) -> (i32, i32) {
    %c0_i32 = arith.constant 0 : i32
    %c0_i32_0 = arith.constant 0 : i32
    %c0_i32_1 = arith.constant 0 : i32
    return %c0_i32, %c0_i32_0 : i32, i32
  }
  func.func @transform_12(%arg0: i32) -> (i32, i32) {
    %c0_i32 = arith.constant 0 : i32
    %c0_i32_0 = arith.constant 0 : i32
    %c0_i32_1 = arith.constant 0 : i32
    return %c0_i32, %c0_i32_0 : i32, i32
  }
  func.func @transform_13(%arg0: i32) -> (i32, i32) {
    %c0_i32 = arith.constant 0 : i32
    %c0_i32_0 = arith.constant 0 : i32
    return %c0_i32, %arg0 : i32, i32
  }
  func.func @transform_14(%arg0: i32) -> (i32, i32) {
    %c0_i32 = arith.constant 0 : i32
    %c0_i32_0 = arith.constant 0 : i32
    return %c0_i32, %arg0 : i32, i32
  }
  func.func @transform_15(%arg0: i32) -> (i32, i32) {
    %c0_i32 = arith.constant 0 : i32
    %c0_i32_0 = arith.constant 0 : i32
    return %c0_i32, %arg0 : i32, i32
  }
}

</mosaic_0001>

<bundles_post_ra>
// kernel: generator_forward.1
= control target key start
LH: loop header
LB: loop body
LE: loop exit
PB: predicated region body
PF: predicated region fallthrough
CT: control target
= control target key end

     0   :  { %v981_v0 = vmov 0.0   ;;  %vm982_vm0 = vmmov 0   ;;  %vm119_vm1 = vcmask 1043456   ;;  %vm70_vm2 = vcmask 130048   ;;  %s1290_s3 = inlined_call_operand.vmem [shape: bf16[16,128], index: 3, kind: input, shape index: {}]   ;;  %s1291_s1 = inlined_call_operand.vmem [shape: f32[16,16], index: 1, kind: input, shape index: {}]   ;;  %s1292_s2 = inlined_call_operand.vmem [shape: bf16[8,128], index: 2, kind: input, shape index: {}]   ;;  %s1293_s5 = inlined_call_operand.vmem [shape: bf16[128,256], index: 5, kind: input, shape index: {}]   ;;  %s1294_s0 = inlined_call_operand.vmem [shape: f32[16,8], index: 0, kind: input, shape index: {}]   ;;  %s1295_s4 = inlined_call_operand.vmem [shape: f32[1,128], index: 4, kind: input, shape index: {}]   ;;  %s1296_s9 = inlined_call_operand.vmem [shape: bf16[256,128], index: 9, kind: input, shape index: {}]   ;;  %s1297_s6 = inlined_call_operand.vmem [shape: f32[1,256], index: 6, kind: input, shape index: {}]   ;;  %s1298_s7 = inlined_call_operand.vmem [shape: f32[1,256], index: 7, kind: input, shape index: {}]   ;;  %s1299_s8 = inlined_call_operand.vmem [shape: f32[1,256], index: 8, kind: input, shape index: {}]   ;;  %s1300_s13 = inlined_call_operand.vmem [shape: bf16[128,128], index: 13, kind: input, shape index: {}]   ;;  %s1301_s10 = inlined_call_operand.vmem [shape: f32[1,128], index: 10, kind: input, shape index: {}]   ;;  %s1302_s11 = inlined_call_operand.vmem [shape: f32[1,128], index: 11, kind: input, shape index: {}]   ;;  %s1303_s12 = inlined_call_operand.vmem [shape: f32[1,128], index: 12, kind: input, shape index: {}]   ;;  %s1304_s14 = inlined_call_operand.vmem [shape: f32[1,128], index: 14, kind: input, shape index: {}]   ;;  %s1305_s15 = inlined_call_operand.vmem [shape: f32[16,128], index: 15, kind: output, shape index: {}]  }
   0x1   :  { %890 = vmatprep.subr.bf16.mxu1 %v981_v0  ;;  %v926_v1 = vld [vmem:[%s1290_s3] sm:$0xff]   ;;  %892 = vmatprep.mubr.msk.bf16.mxu1 %vm982_vm0, %v981_v0  ;;  %v60_v3 = vld [vmem:[%s1291_s1 + $0x8] sm:$0xff]  ;;  %v927_v7 = vld [vmem:[%s1293_s5 + $0x74] ss:$8 sps:$4 sm:$0xff]   ;;  %vm115_vm3 = vcmask 64512   ;;  %v983_v26 = vmov 0   ;;  %v198_v61 = vlaneseq }
   0x2   :  { %v59_v2 = vld [vmem:[%s1291_s1] sm:$0xff]  ;;  %891 = vmatpush3.bf16.msra.mxu1 %v926_v1  ;;  %v929_v8 = vld [vmem:[%s1293_s5 + $0x70] ss:$8 sps:$4 sm:$0xff]   ;;  %v56_v11 = vld [vmem:[%s1294_s0 + $0x8] sm:$0xff]  ;;  %288 = vmatprep.subr.bf16.mxu0 %v927_v7 }
   0x3   :  { %v58_v4 = vld [vmem:[%s1292_s2] sm:$0xf]  ;;  %v61_v5 = vpack.c.bf16 %v60_v3, %v59_v2  ;;  %896 = vmatprep.subr.bf16.mxu1 %v981_v0  ;;  %v930_v10 = vld [vmem:[%s1293_s5 + $0x64] ss:$8 sps:$4 sm:$0xff]   ;;  %v933_v13 = vld [vmem:[%s1293_s5 + $0x54] ss:$8 sps:$4 sm:$0xff]   ;;  %289 = vmatpush1.bf16.msra.mxu0 %v929_v8 }
   0x4   :  { %v121_v6 = vsel %vm119_vm1, %v58_v4, 0  ;;  %v55_v9 = vld [vmem:[%s1294_s0] sm:$0xff]  ;;  %290 = vmatprep.subr.bf16.mxu0 %v930_v10  ;;  %v935_v15 = vld [vmem:[%s1293_s5 + $0x50] ss:$8 sps:$4 sm:$0xff]   ;;  %v939_v18 = vld [vmem:[%s1293_s5 + $0x34] ss:$8 sps:$4 sm:$0xff]   ;;  %320 = vmatprep.mubr.bf16.mxu0 %v983_v26 }
   0x5   :  { %893 = vmatmul.mubr.msk.bf16.vlgmr.msra.gmra.mxu1 %vm70_vm2, %v61_v5  ;;  %v932_v12 = vld [vmem:[%s1293_s5 + $0x60] ss:$8 sps:$4 sm:$0xff]   ;;  %v57_v14 = vpack.c.bf16 %v56_v11, %v55_v9  ;;  %v936_v16 = vld [vmem:[%s1293_s5 + $0x44] ss:$8 sps:$4 sm:$0xff]   ;;  %v941_v19 = vld [vmem:[%s1293_s5 + $0x30] ss:$8 sps:$4 sm:$0xff]  }
   0x6   :  { %897 = vmatpush3.bf16.msra.mxu1 %v121_v6  ;;  %898 = vmatprep.mubr.msk.bf16.mxu1 %vm982_vm0, %v981_v0  ;;  %v938_v17 = vld [vmem:[%s1293_s5 + $0x40] ss:$8 sps:$4 sm:$0xff]   ;;  %v942_v20 = vld [vmem:[%s1293_s5 + $0x24] ss:$8 sps:$4 sm:$0xff]   ;;  %v945_v22 = vld [vmem:[%s1293_s5 + $0x14] ss:$8 sps:$4 sm:$0xff]  }
   0x7   :  { %291 = vmatpush1.bf16.msra.mxu0 %v932_v12  ;;  %v944_v21 = vld [vmem:[%s1293_s5 + $0x20] ss:$8 sps:$4 sm:$0xff]   ;;  %v947_v23 = vld [vmem:[%s1293_s5 + $0x10] ss:$8 sps:$4 sm:$0xff]   ;;  %v948_v24 = vld [vmem:[%s1293_s5 + $0x4] ss:$8 sps:$4 sm:$0xff]  }
   0x8   :  { %292 = vmatprep.subr.bf16.mxu0 %v933_v13  ;;  %v950_v25 = vld [vmem:[%s1293_s5] ss:$8 sps:$4 sm:$0xff]   ;;  %v951_v45 = vld [vmem:[%s1296_s9 + $0x78] sm:$0xff]   ;;  %v953_v47 = vld [vmem:[%s1296_s9 + $0x70] sm:$0xff]   ;;  %v1191_v62 = vshrl.u32 %v198_v61, 7 }
   0x9   :  { %v812_v32 = vld [vmem:[%s1295_s4] ss:$0 sm:$0xff]  ;;  %v952_v46 = vld [vmem:[%s1296_s9 + $0x38] sm:$0xff]   ;;  %859 = vmatprep.subr.bf16.mxu1 %v951_v45  ;;  %v954_v48 = vld [vmem:[%s1296_s9 + $0x30] sm:$0xff]  }
   0xa   :  { %v955_v49 = vld [vmem:[%s1296_s9 + $0x68] sm:$0xff]   ;;  %v957_v51 = vld [vmem:[%s1296_s9 + $0x60] sm:$0xff]   ;;  %v959_v53 = vld [vmem:[%s1296_s9 + $0x58] sm:$0xff]   ;;  %v1194_v63 = vsub.s32 0, %v1191_v62  ;;  %v1200_v2 = vsub.s32 1, %v1191_v62 }
   0xb   :  { %293 = vmatpush1.bf16.msra.mxu0 %v935_v15  ;;  %v956_v50 = vld [vmem:[%s1296_s9 + $0x28] sm:$0xff]   ;;  %v958_v52 = vld [vmem:[%s1296_s9 + $0x20] sm:$0xff]   ;;  %v960_v54 = vld [vmem:[%s1296_s9 + $0x18] sm:$0xff]  }
   0xc   :  { %294 = vmatprep.subr.bf16.mxu0 %v936_v16  ;;  %v961_v55 = vld [vmem:[%s1296_s9 + $0x50] sm:$0xff]   ;;  %v963_v57 = vld [vmem:[%s1296_s9 + $0x48] sm:$0xff]   ;;  %v965_v59 = vld [vmem:[%s1296_s9 + $0x40] sm:$0xff]  }
   0xd   :  { %899 = vmatmul.mubr.msk.bf16.vlgmr.msra.gmra.mxu1 %vm115_vm3, %v57_v14  ;;  %v962_v56 = vld [vmem:[%s1296_s9 + $0x10] sm:$0xff]   ;;  %v964_v58 = vld [vmem:[%s1296_s9 + $0x8] sm:$0xff]   ;;  %v966_v60 = vld [vmem:[%s1296_s9] sm:$0xff]  }
   0xe   :  { %860 = vmatpush3.bf16.msra.mxu1 %v952_v46  ;;  %v196_v1 = vld [vmem:[%s1297_s6] sm:$0x3] }
   0xf   :  { %295 = vmatpush1.bf16.msra.mxu0 %v938_v17  ;;  %861 = vmatprep.subr.bf16.mxu1 %v953_v47  ;;  %v201_v3 = vrot.slane %v196_v1, %v1194_v63  ;;  %v205_v5 = vrot.slane %v196_v1, %v1200_v2 }
  0x10   :  { %296 = vmatprep.subr.bf16.mxu0 %v939_v18 }
  0x12   :  { %862 = vmatpush3.bf16.msra.mxu1 %v954_v48 }
  0x13   :  { %297 = vmatpush1.bf16.msra.mxu0 %v941_v19  ;;  %863 = vmatprep.subr.bf16.mxu1 %v955_v49 }
  0x14   :  { %298 = vmatprep.subr.bf16.mxu0 %v942_v20 }
  0x16   :  { %864 = vmatpush3.bf16.msra.mxu1 %v956_v50 }
  0x17   :  { %299 = vmatpush1.bf16.msra.mxu0 %v944_v21  ;;  %865 = vmatprep.subr.bf16.mxu1 %v957_v51 }
  0x18   :  { %300 = vmatprep.subr.bf16.mxu0 %v945_v22 }
  0x1a   :  { %866 = vmatpush3.bf16.msra.mxu1 %v958_v52 }
  0x1b   :  { %301 = vmatpush1.bf16.msra.mxu0 %v947_v23  ;;  %867 = vmatprep.subr.bf16.mxu1 %v959_v53 }
  0x1c   :  { %302 = vmatprep.subr.bf16.mxu0 %v948_v24 }
  0x1e   :  { %868 = vmatpush3.bf16.msra.mxu1 %v960_v54 }
  0x1f   :  { %303 = vmatpush1.bf16.msra.mxu0 %v950_v25  ;;  %869 = vmatprep.subr.bf16.mxu1 %v961_v55  ;;  %v984_v55 = vmov 1966171168  }
  0x20   :  { %902 = vmatprep.subr.bf16.mxu0 %v981_v0 }
  0x22   :  { %870 = vmatpush3.bf16.msra.mxu1 %v962_v56  ;;  %v381_v56 = vunpack.c.l.s4 %v984_v55 }
  0x23   :  { %871 = vmatprep.subr.bf16.mxu1 %v963_v57 }
  0x24   :  { %v382_v57 = vunpack.c.0.s8 %v381_v56 }
  0x26   :  { %872 = vmatpush3.bf16.msra.mxu1 %v964_v58 }
  0x27   :  { %873 = vmatprep.subr.bf16.mxu1 %v965_v59  ;;  %v385_v59 = vsub.s32 %v382_v57, %v1191_v62  ;;  %v332_v62 = vld [vmem:[%s1299_s8] sm:$0x3] }
  0x2a   :  { %874 = vmatpush3.bf16.msra.mxu1 %v966_v60 }
  0xc5   :  { %v108_v27 = vpop.f32.mrf.mxu1 }
  0xc7   :  { %v894_v28 = vpop.f32.mrf.mxu1 }
  0xc9   :  { %v111_v29 = vpop.f32.mrf.mxu1 }
  0xcb   :  { %v895_v30 = vpop.f32.mrf.mxu1 }
  0xcd   :  { %v157_v31 = vpop.f32.mrf.mxu1 }
  0xce   :  { %v158_v33 = vadd.f32 %v157_v31, %v108_v27 }
  0xcf   :  { %v900_v34 = vpop.f32.mrf.mxu1 }
  0xd0   :  { %v171_v35 = vadd.f32 %v812_v32, %v158_v33 }
  0xd1   :  { %v160_v36 = vpop.f32.mrf.mxu1 }
  0xd2   :  { %v161_v37 = vadd.f32 %v160_v36, %v111_v29  ;;  %v175_v39 = vmul.f32 0.2, %v171_v35  ;;  %vm173_vm4 = vcmp.ge.f32.partialorder %v171_v35, 0.0 }
  0xd3   :  { %v901_v38 = vpop.f32.mrf.mxu1 }
  0xd4   :  { %v172_v40 = vadd.f32 %v812_v32, %v161_v37  ;;  %v177_v42 = vsel %vm173_vm4, %v171_v35, %v175_v39 }
  0xd6   :  { %vm174_vm5 = vcmp.ge.f32.partialorder %v172_v40, 0.0  ;;  %v176_v41 = vmul.f32 0.2, %v172_v40 }
  0xd8   :  { %v178_v43 = vsel %vm174_vm5, %v172_v40, %v176_v41 }
  0xd9   :  { %v179_v44 = vpack.c.bf16 %v178_v43, %v177_v42 }
  0xdb   :  { %321 = vmatmul.mubr.bf16.vlgmr.msra.gmra.mxu0 %v179_v44 }
  0xdc   :  { %918 = vmatprep.mubr.msk.bf16.mxu0 %vm982_vm0, %v981_v0 }
 0x19b   :  { %v322_v4 = vpop.f32.mrf.mxu0 }
 0x19c   :  { %v1204_v7 = vadd.f32 %v322_v4, %v201_v3 }
 0x19d   :  { %v324_v6 = vpop.f32.mrf.mxu0 }
 0x19e   :  { %v1206_v8 = vadd.f32 %v324_v6, %v205_v5  ;;  %v347_v12 = vmul.f32 %v1204_v7, %v1204_v7 }
 0x19f   :  { %v326_v9 = vpop.f32.mrf.mxu0 }
 0x1a0   :  { %v1208_v10 = vadd.f32 %v326_v9, %v201_v3  ;;  %v348_v16 = vmul.f32 %v1206_v8, %v1206_v8  ;;  %v331_v3 = vld [vmem:[%s1298_s7] sm:$0x3] }
 0x1a1   :  { %v328_v11 = vpop.f32.mrf.mxu0 }
 0x1a2   :  { %v333_v13 = vadd.f32 %v1208_v10, %v1204_v7  ;;  %v349_v14 = vmul.f32 %v1208_v10, %v1208_v10  ;;  %v1216_v15 = vadd.f32 %v328_v11, %v205_v5 }
 0x1a4   :  { %v334_v17 = vrot.slane %v333_v13, 4  ;;  %v351_v18 = vadd.f32 %v349_v14, %v347_v12  ;;  %v340_v19 = vadd.f32 %v1216_v15, %v1206_v8  ;;  %v350_v20 = vmul.f32 %v1216_v15, %v1216_v15 }
 0x1a6   :  { %v335_v21 = vadd.f32 %v334_v17, %v333_v13  ;;  %v352_v22 = vrot.slane %v351_v18, 4  ;;  %v341_v23 = vrot.slane %v340_v19, 4  ;;  %v358_v24 = vadd.f32 %v350_v20, %v348_v16 }
 0x1a8   :  { %v336_v25 = vrot.slane %v335_v21, 2  ;;  %v353_v26 = vadd.f32 %v352_v22, %v351_v18  ;;  %v342_v27 = vadd.f32 %v341_v23, %v340_v19  ;;  %v359_v28 = vrot.slane %v358_v24, 4 }
 0x1aa   :  { %v337_v29 = vadd.f32 %v336_v25, %v335_v21  ;;  %v354_v30 = vrot.slane %v353_v26, 2  ;;  %v343_v31 = vrot.slane %v342_v27, 2  ;;  %v360_v32 = vadd.f32 %v359_v28, %v358_v24 }
 0x1ac   :  { %v338_v33 = vrot.slane %v337_v29, 1  ;;  %v355_v34 = vadd.f32 %v354_v30, %v353_v26  ;;  %v344_v35 = vadd.f32 %v343_v31, %v342_v27  ;;  %v361_v36 = vrot.slane %v360_v32, 2 }
 0x1ae   :  { %v339_v37 = vadd.f32 %v338_v33, %v337_v29  ;;  %v356_v38 = vrot.slane %v355_v34, 1  ;;  %v345_v39 = vrot.slane %v344_v35, 1  ;;  %v362_v40 = vadd.f32 %v361_v36, %v360_v32  ;;  %v970_v36 = vld [vmem:[%s1300_s13 + $0x20] sm:$0xff]  }
 0x1b0   :  { %v357_v41 = vadd.f32 %v356_v38, %v355_v34  ;;  %v365_v42 = vmul.f32 0.0625, %v339_v37  ;;  %v346_v43 = vadd.f32 %v345_v39, %v344_v35  ;;  %v363_v44 = vrot.slane %v362_v40, 1  ;;  %v968_v34 = vld [vmem:[%s1300_s13 + $0x30] sm:$0xff]   ;;  %v969_v35 = vld [vmem:[%s1300_s13 + $0x28] sm:$0xff]   ;;  %v971_v37 = vld [vmem:[%s1300_s13 + $0x18] sm:$0xff]  }
 0x1b1   :  { %v972_v38 = vld [vmem:[%s1300_s13 + $0x10] sm:$0xff]   ;;  %v973_v39 = vld [vmem:[%s1300_s13 + $0x8] sm:$0xff]  }
 0x1b2   :  { %v367_v45 = vmul.f32 0.0625, %v357_v41  ;;  %v369_v46 = vmul.f32 %v365_v42, %v365_v42  ;;  %v364_v47 = vadd.f32 %v363_v44, %v362_v40  ;;  %v366_v48 = vmul.f32 0.0625, %v346_v43  ;;  %v974_v40 = vld [vmem:[%s1300_s13] sm:$0xff]  }
 0x1b3   :  { %v829_v44 = vld [vmem:[%s1301_s10] ss:$0 sm:$0xff] }
 0x1b4   :  { %v371_v49 = vsub.f32 %v367_v45, %v369_v46  ;;  %v368_v50 = vmul.f32 0.0625, %v364_v47  ;;  %v370_v51 = vmul.f32 %v366_v48, %v366_v48 }
 0x1b6   :  { %v373_v52 = vadd.f32 1e-05, %v371_v49  ;;  %v372_v53 = vsub.f32 %v368_v50, %v370_v51 }
 0x1b8   :  { %v374_v54 = vadd.f32 1e-05, %v372_v53  ;;  %975 = vrsqrt.f32 %v373_v52 }
 0x1ba   :  { %977 = vrsqrt.f32 %v374_v54 }
 0x1c5   :  { %v976_v58 = vpop.eup %975 }
 0x1c7   :  { %v978_v60 = vpop.eup %977 }
 0x1c8   :  { %v379_v61 = vcombine.low %v976_v58, %v978_v60 }
 0x1ca   :  { %v386_v1 = vrot.slane %v379_v61, %v385_v59 }
 0x1cc   :  { %v393_v4 = vrot.slane %v386_v1, %v385_v59 }
 0x1ce   :  { %v395_v5 = vmul.f32 %v393_v4, %v331_v3 }
 0x1d0   :  { %v400_v6 = vrot.slane %v395_v5, %v1194_v63  ;;  %v404_v9 = vrot.slane %v395_v5, %v1200_v2 }
 0x1d2   :  { %v407_v11 = vmul.f32 %v400_v6, %v365_v42  ;;  %v408_v12 = vmul.f32 %v404_v9, %v366_v48  ;;  %v431_v18 = vmul.f32 %v404_v9, %v1216_v15  ;;  %v429_v19 = vmul.f32 %v404_v9, %v1206_v8 }
 0x1d3   :  { %v428_v22 = vmul.f32 %v400_v6, %v1204_v7  ;;  %v430_v23 = vmul.f32 %v400_v6, %v1208_v10  ;;  %v967_v10 = vld [vmem:[%s1300_s13 + $0x38] sm:$0xff]  }
 0x1d4   :  { %v411_v13 = vcombine.low %v407_v11, %v408_v12  ;;  %903 = vmatpush3.bf16.msra.mxu0 %v967_v10 }
 0x1d5   :  { %904 = vmatprep.subr.bf16.mxu0 %v981_v0 }
 0x1d6   :  { %v418_v14 = vrot.slane %v411_v13, %v385_v59  ;;  %v637_v13 = vld [vmem:[%s1302_s11] sm:$0x1] }
 0x1d8   :  { %v425_v16 = vrot.slane %v418_v14, %v385_v59  ;;  %905 = vmatpush3.bf16.msra.mxu0 %v968_v34 }
 0x1d9   :  { %906 = vmatprep.subr.bf16.mxu0 %v981_v0 }
 0x1da   :  { %v427_v17 = vsub.f32 %v332_v62, %v425_v16  ;;  %v638_v16 = vld [vmem:[%s1303_s12] sm:$0x1] }
 0x1dc   :  { %v436_v20 = vrot.slane %v427_v17, %v1194_v63  ;;  %v440_v21 = vrot.slane %v427_v17, %v1200_v2  ;;  %907 = vmatpush3.bf16.msra.mxu0 %v969_v35 }
 0x1dd   :  { %908 = vmatprep.subr.bf16.mxu0 %v981_v0 }
 0x1de   :  { %v446_v24 = vadd.f32 %v440_v21, %v431_v18  ;;  %v444_v25 = vadd.f32 %v440_v21, %v429_v19  ;;  %v443_v26 = vadd.f32 %v436_v20, %v428_v22  ;;  %v445_v27 = vadd.f32 %v436_v20, %v430_v23 }
 0x1e0   :  { %vm448_vm6 = vcmp.ge.f32.partialorder %v444_v25, 0.0  ;;  %vm450_vm7 = vcmp.ge.f32.partialorder %v446_v24, 0.0  ;;  %v452_v28 = vmul.f32 0.2, %v444_v25  ;;  %v454_v29 = vmul.f32 0.2, %v446_v24  ;;  %909 = vmatpush3.bf16.msra.mxu0 %v970_v36 }
 0x1e1   :  { %vm447_vm8 = vcmp.ge.f32.partialorder %v443_v26, 0.0  ;;  %vm449_vm9 = vcmp.ge.f32.partialorder %v445_v27, 0.0  ;;  %v451_v15 = vmul.f32 0.2, %v443_v26  ;;  %v453_v8 = vmul.f32 0.2, %v445_v27  ;;  %910 = vmatprep.subr.bf16.mxu0 %v981_v0 }
 0x1e2   :  { %v456_v30 = vsel %vm448_vm6, %v444_v25, %v452_v28  ;;  %v458_v31 = vsel %vm450_vm7, %v446_v24, %v454_v29 }
 0x1e3   :  { %v460_v32 = vpack.c.bf16 %v458_v31, %v456_v30  ;;  %v455_v2 = vsel %vm447_vm8, %v443_v26, %v451_v15  ;;  %v457_v33 = vsel %vm449_vm9, %v445_v27, %v453_v8  ;;  %v846_v15 = vld [vmem:[%s1304_s14] ss:$0 sm:$0xff] }
 0x1e4   :  { %v459_v7 = vpack.c.bf16 %v457_v33, %v455_v2  ;;  %911 = vmatpush3.bf16.msra.mxu0 %v971_v37 }
 0x1e5   :  { %628 = vmatprep.mubr.bf16.mxu1 %v460_v32  ;;  %912 = vmatprep.subr.bf16.mxu0 %v981_v0 }
 0x1e6   :  { %629 = vmatmul.mubr.bf16.vlgmr.msra.gmra.mxu1 %v459_v7 }
 0x1e8   :  { %913 = vmatpush3.bf16.msra.mxu0 %v972_v38 }
 0x1e9   :  { %914 = vmatprep.subr.bf16.mxu0 %v981_v0 }
 0x1ec   :  { %915 = vmatpush3.bf16.msra.mxu0 %v973_v39 }
 0x1ed   :  { %916 = vmatprep.subr.bf16.mxu0 %v981_v0 }
 0x1f0   :  { %917 = vmatpush3.bf16.msra.mxu0 %v974_v40 }
 0x2a6   :  { %v875_v41 = vpop.f32.mrf.mxu1 }
 0x2a8   :  { %v876_v42 = vpop.f32.mrf.mxu1 }
 0x2a9   :  { %v877_v43 = vadd.f32 %v876_v42, %v875_v41 }
 0x2aa   :  { %v878_v45 = vpop.f32.mrf.mxu1 }
 0x2ab   :  { %v631_v47 = vadd.f32 %v877_v43, %v829_v44 }
 0x2ac   :  { %v879_v46 = vpop.f32.mrf.mxu1 }
 0x2ad   :  { %v880_v48 = vadd.f32 %v879_v46, %v878_v45  ;;  %v646_v50 = vmul.f32 %v631_v47, %v631_v47 }
 0x2af   :  { %v634_v49 = vadd.f32 %v880_v48, %v829_v44 }
 0x2b1   :  { %v639_v51 = vadd.f32 %v634_v49, %v631_v47  ;;  %v647_v52 = vmul.f32 %v634_v49, %v634_v49 }
 0x2b3   :  { %v640_v53 = vrot.slane %v639_v51, 4  ;;  %v648_v54 = vadd.f32 %v647_v52, %v646_v50 }
 0x2b5   :  { %v641_v55 = vadd.f32 %v640_v53, %v639_v51  ;;  %v649_v0 = vrot.slane %v648_v54, 4 }
 0x2b7   :  { %v642_v56 = vrot.slane %v641_v55, 2  ;;  %v650_v57 = vadd.f32 %v649_v0, %v648_v54 }
 0x2b9   :  { %v643_v58 = vadd.f32 %v642_v56, %v641_v55  ;;  %v651_v59 = vrot.slane %v650_v57, 2 }
 0x2bb   :  { %v644_v60 = vrot.slane %v643_v58, 1  ;;  %v652_v61 = vadd.f32 %v651_v59, %v650_v57 }
 0x2bd   :  { %v645_v1 = vadd.f32 %v644_v60, %v643_v58  ;;  %v653_v3 = vrot.slane %v652_v61, 1 }
 0x2bf   :  { %v654_v4 = vadd.f32 %v653_v3, %v652_v61  ;;  %v655_v5 = vmul.f32 0.0625, %v645_v1 }
 0x2c1   :  { %v656_v6 = vmul.f32 0.0625, %v654_v4  ;;  %v657_v9 = vmul.f32 %v655_v5, %v655_v5 }
 0x2c3   :  { %v658_v11 = vsub.f32 %v656_v6, %v657_v9 }
 0x2c5   :  { %v659_v12 = vadd.f32 1e-05, %v658_v11 }
 0x2c7   :  { %979 = vrsqrt.f32 %v659_v12 }
 0x2d4   :  { %v980_v14 = vpop.eup %979 }
 0x2d5   :  { %v661_v62 = vmul.f32 %v980_v14, %v637_v13 }
 0x2d7   :  { %v662_v17 = vmul.f32 %v661_v62, %v655_v5  ;;  %v668_v18 = vrot.slane %v661_v62, %v1194_v63 }
 0x2d9   :  { %v663_v19 = vsub.f32 %v638_v16, %v662_v17  ;;  %v670_v20 = vmul.f32 %v668_v18, %v631_v47  ;;  %v671_v21 = vmul.f32 %v668_v18, %v634_v49 }
 0x2db   :  { %v676_v22 = vrot.slane %v663_v19, %v1194_v63 }
 0x2dd   :  { %v679_v23 = vadd.f32 %v676_v22, %v671_v21  ;;  %v678_v24 = vadd.f32 %v676_v22, %v670_v20 }
 0x2df   :  { %vm680_vm10 = vcmp.ge.f32.partialorder %v678_v24, 0.0  ;;  %vm681_vm11 = vcmp.ge.f32.partialorder %v679_v23, 0.0  ;;  %v682_v25 = vmul.f32 0.2, %v678_v24  ;;  %v683_v26 = vmul.f32 0.2, %v679_v23 }
 0x2e1   :  { %v684_v27 = vsel %vm680_vm10, %v678_v24, %v682_v25  ;;  %v685_v28 = vsel %vm681_vm11, %v679_v23, %v683_v26 }
 0x2e2   :  { %v690_v29 = vpack.c.bf16 %v685_v28, %v684_v27 }
 0x2e4   :  { %919 = vmatmul.mubr.bf16.vlgmr.msra.gmra.mxu0 %v690_v29 }
 0x3a4   :  { %v796_v8 = vpop.f32.mrf.mxu0 }
 0x3a5   :  { %v797_v30 = vadd.f32 %v846_v15, %v796_v8 }
 0x3a6   :  { %v920_v31 = vpop.f32.mrf.mxu0 }
 0x3a7   :  { %803 = vst [vmem:[%s1305_s15] sm:$0xff] %v797_v30 }
 0x3a8   :  { %v799_v63 = vpop.f32.mrf.mxu0 }
 0x3a9   :  { %v800_v32 = vadd.f32 %v846_v15, %v799_v63 }
 0x3aa   :  { %v921_v2 = vpop.f32.mrf.mxu0 }
 0x3ab   :  { %804 = vst [vmem:[%s1305_s15 + $0x8] sm:$0xff] %v800_v32 }

</bundles_post_ra>
